<compile_context>
chip_gen: v7x
topology: tpu7x:2x2x1
jax: 0.10.0
libtpu: 0.0.40
codegen_flags: <defaults>
</compile_context>

<pallas_src>
import functools

import jax
import jax.numpy as jnp
from jax.experimental import pallas as pl
from jax.experimental.pallas import tpu as pltpu


def _round_up(a, m):
    return ((a + m - 1) // m) * m


# ---------------------------------------------------------------------------
# Pallas kernel: fused masked 3x3 conv (+ 1x1 ctx proj) -> ReLU -> 1x1 conv
# Streamed operand layout: (C[+Cc], tile_cols + 2*halo)  channel-major, bf16.
# Output layout:           (2C, tile_cols)               f32, lane-dense.
# ---------------------------------------------------------------------------
def _ar_conv_body(x_ref, w1t_ref, wyt_ref, b1_ref, w2t_ref, b2_ref, o_ref,
                  offsets, c_in, halo):
    t_out = o_ref.shape[1]                       # tile_cols (multiple of 128)
    hd = b1_ref.shape[0]
    xb = x_ref[...]                              # (C[+Cc], tile_cols + 2*halo) bf16

    acc = jnp.zeros((hd, t_out), jnp.float32)
    # 9 masked-conv taps: static, unrolled; each tap is a static column shift
    # of the flat padded-image layout (shift-and-matmul instead of im2col).
    for tap, off in enumerate(offsets):
        s = halo + off                           # static, always in [0, 2*halo]
        acc = acc + jnp.dot(w1t_ref[tap], xb[:c_in, s:s + t_out],
                            preferred_element_type=jnp.float32)
    if wyt_ref is not None:                      # fused 1x1 context projection
        acc = acc + jnp.dot(wyt_ref[...], xb[c_in:, halo:halo + t_out],
                            preferred_element_type=jnp.float32)

    h = jnp.maximum(acc + b1_ref[...], 0.0).astype(jnp.bfloat16)
    out = jnp.dot(w2t_ref[...], h, preferred_element_type=jnp.float32) + b2_ref[...]
    o_ref[...] = out.astype(o_ref.dtype)


def _ar_conv_kernel_ctx(x_ref, w1t_ref, wyt_ref, b1_ref, w2t_ref, b2_ref, o_ref,
                        *, offsets, c_in, halo):
    _ar_conv_body(x_ref, w1t_ref, wyt_ref, b1_ref, w2t_ref, b2_ref, o_ref,
                  offsets, c_in, halo)


def _ar_conv_kernel_noctx(x_ref, w1t_ref, b1_ref, w2t_ref, b2_ref, o_ref,
                          *, offsets, c_in, halo):
    _ar_conv_body(x_ref, w1t_ref, None, b1_ref, w2t_ref, b2_ref, o_ref,
                  offsets, c_in, halo)


def _ar_conv_pallas(xk, w1t, wyt, b1, w2t, b2, *, halo, tile_cols, offsets):
    """xk: (num_tiles, K0, tile_cols + 2*halo) bf16.  Returns (2C, num_tiles*tile_cols) f32."""
    nt, k0, t_in = xk.shape
    _, hd, c_in = w1t.shape
    cout = w2t.shape[0]

    if wyt is not None:
        kernel = functools.partial(_ar_conv_kernel_ctx,
                                   offsets=offsets, c_in=c_in, halo=halo)
    else:
        kernel = functools.partial(_ar_conv_kernel_noctx,
                                   offsets=offsets, c_in=c_in, halo=halo)

    # Streamed activations (double-buffered by Pallas) + resident weights.
    in_specs = [
        pl.BlockSpec((None, k0, t_in), lambda i: (i, 0, 0)),
        pl.BlockSpec(w1t.shape, lambda i: (0, 0, 0)),
    ]
    operands = [xk, w1t]
    if wyt is not None:
        in_specs.append(pl.BlockSpec(wyt.shape, lambda i: (0, 0)))
        operands.append(wyt)
    in_specs += [
        pl.BlockSpec(b1.shape, lambda i: (0, 0)),
        pl.BlockSpec(w2t.shape, lambda i: (0, 0)),
        pl.BlockSpec(b2.shape, lambda i: (0, 0)),
    ]
    operands += [b1, w2t, b2]

    return pl.pallas_call(
        kernel,
        out_shape=jax.ShapeDtypeStruct((cout, nt * tile_cols), jnp.float32),
        grid_spec=pltpu.PrefetchScalarGridSpec(
            num_scalar_prefetch=0,
            grid=(nt,),
            in_specs=in_specs,
            out_specs=pl.BlockSpec((cout, tile_cols), lambda i: (0, i)),
        ),
        compiler_params=pltpu.CompilerParams(
            dimension_semantics=("parallel",),
        ),
    )(*operands)


# ---------------------------------------------------------------------------
# Parameter construction (deterministic) + autoregressive masks (glue)
# ---------------------------------------------------------------------------
def make_params(c_in, c_ctx, hidden, key):
    k1, k2, k3 = jax.random.split(key, 3)
    c_out = 2 * c_in

    # 3x3 masked conv weights, (ky, kx, c_in, hidden).
    w1 = 0.1 * jax.random.normal(k1, (3, 3, c_in, hidden), jnp.float32)
    hid_group = jnp.arange(hidden) % c_in                       # (hidden,)
    ci = jnp.arange(c_in)                                       # (c_in,)
    center_mask = (ci[:, None] < hid_group[None, :]).astype(jnp.float32)
    mask = jnp.zeros((3, 3, c_in, hidden), jnp.float32)
    mask = mask.at[0].set(1.0)             # row above center
    mask = mask.at[1, 0].set(1.0)          # left of center
    mask = mask.at[1, 1].set(center_mask)  # center: strict (type A)
    w1 = w1 * mask                         # masks baked in; kept 4-D

    # Context 1x1 projection (fully connected -- context is exogenous).
    wy = 0.1 * jax.random.normal(k2, (c_ctx, hidden), jnp.float32)
    b1 = jnp.zeros((1, hidden), jnp.float32)

    # 1x1 output conv (hidden -> 2*c_in), type-B channel mask.
    w2 = 0.1 * jax.random.normal(k3, (hidden, c_out), jnp.float32)
    co_group = jnp.arange(c_out) % c_in
    mask2 = (hid_group[:, None] <= co_group[None, :]).astype(jnp.float32)
    w2 = w2 * mask2
    b2 = jnp.zeros((1, c_out), jnp.float32)

    return dict(w1=w1, wy=wy, b1=b1, w2=w2, b2=b2)


# ---------------------------------------------------------------------------
# AutoregressiveModel.forward equivalent
# ---------------------------------------------------------------------------
def autoregressive_model_forward(params, x, context=None):
    """x: (..., C, H, W) NCHW, optionally with a leading MC-sample dim (5-D).
    Returns (loc, log_scale), each (mc_samples, B, C, H, W)."""
    mc_samples = 1
    if x.ndim > 4:
        mc_samples = x.shape[0]
        x = x.reshape(-1, *x.shape[2:])
        if context is not None:
            assert x.shape[0] == context.shape[0]

    n, c, h, w = x.shape
    hp, wp = h + 2, w + 2
    halo = wp + 1                                  # max |3x3 tap offset| in flat layout
    limg = _round_up(hp * wp, 128)                 # per-image flat length, lane-padded
    hd = params["b1"].shape[-1]
    c_out = params["b2"].shape[-1]

    # ---- pack activations channel-major & flat: (n, K0, limg); pad slots are zero ----
    xp = jnp.pad(x, ((0, 0), (0, 0), (1, 1), (1, 1)))
    xf = jnp.pad(xp.reshape(n, c, hp * wp), ((0, 0), (0, 0), (0, limg - hp * wp)))
    if context is not None:
        cc = context.shape[1]
        cp = jnp.pad(context, ((0, 0), (0, 0), (1, 1), (1, 1)))
        cf = jnp.pad(cp.reshape(n, cc, hp * wp), ((0, 0), (0, 0), (0, limg - hp * wp)))
        xf = jnp.concatenate([xf, cf], axis=1)     # (n, C+Cc, limg): ctx fused in
    k0 = xf.shape[1]

    # ---- tile selection: whole images per tile, ~1024 lanes, >=2 grid steps (v7x) ----
    ipb = max(1, 1024 // limg)
    if n >= 2:
        ipb = min(ipb, (n + 1) // 2)
    else:
        ipb = 1
    n_pad = _round_up(n, ipb)
    if n_pad > n:
        xf = jnp.pad(xf, ((0, n_pad - n), (0, 0), (0, 0)))
    nt = n_pad // ipb
    tile_cols = ipb * limg                          # multiple of 128 -> unmasked stores

    # (nt, ipb, K0, limg) -> (nt, K0, ipb*limg), then zero halo columns on both ends
    # (halo contents are never read for valid pixels; they only keep slices in-bounds).
    xk = jnp.transpose(xf.reshape(nt, ipb, k0, limg), (0, 2, 1, 3)).reshape(nt, k0, tile_cols)
    xk = jnp.pad(xk, ((0, 0), (0, 0), (halo, halo))).astype(jnp.bfloat16)

    # ---- weights, output-channel-major, bf16 (autoregressive masks already baked) ----
    w1t = jnp.transpose(params["w1"], (0, 1, 3, 2)).reshape(9, hd, c).astype(jnp.bfloat16)
    wyt = params["wy"].T.astype(jnp.bfloat16) if context is not None else None
    w2t = params["w2"].T.astype(jnp.bfloat16)
    b1 = params["b1"].reshape(hd, 1).astype(jnp.float32)
    b2 = params["b2"].reshape(c_out, 1).astype(jnp.float32)

    # Flat-layout offsets of the 3x3 taps (tap index = ky*3 + kx, matching w1t).
    offsets = tuple((dy - 1) * wp + (dx - 1) for dy in range(3) for dx in range(3))

    out = _ar_conv_pallas(xk, w1t, wyt, b1, w2t, b2,
                          halo=halo, tile_cols=tile_cols, offsets=offsets)

    # ---- unpack: (2C, n_pad*limg) -> (mc, B', 2C, H, W); chunk along channels ----
    out = out.reshape(c_out, n_pad, limg)[:, :n, :hp * wp].reshape(c_out, n, hp, wp)
    out = out[:, :, 1:h + 1, 1:w + 1]               # drop spatial zero padding
    out = jnp.transpose(out, (1, 0, 2, 3))          # (B', 2C, H, W)
    out = out.reshape(mc_samples, -1, c_out, h, w)
    loc, log_scale = jnp.split(out, 2, axis=2)
    return loc, log_scale


# ---------------------------------------------------------------------------
# Pure-JAX f32 reference (im2col formulation) for correctness checking
# ---------------------------------------------------------------------------
def _reference_forward(params, x, context=None):
    mc_samples = 1
    if x.ndim > 4:
        mc_samples = x.shape[0]
        x = x.reshape(-1, *x.shape[2:])
    n, c, h, w = x.shape
    hd = params["b1"].shape[-1]
    xp = jnp.pad(x, ((0, 0), (0, 0), (1, 1), (1, 1)))
    taps = [xp[:, :, dy:dy + h, dx:dx + w] for dy in range(3) for dx in range(3)]
    patches = jnp.concatenate([jnp.transpose(t, (0, 2, 3, 1)) for t in taps], axis=-1)
    patches = patches.reshape(n * h * w, 9 * c)
    pre = patches @ params["w1"].reshape(9 * c, hd) + params["b1"]
    if context is not None:
        ctx = jnp.transpose(context, (0, 2, 3, 1)).reshape(n * h * w, -1)
        pre = pre + ctx @ params["wy"]
    hid = jnp.maximum(pre, 0.0)
    out = hid @ params["w2"] + params["b2"]
    out = jnp.transpose(out.reshape(n, h, w, -1), (0, 3, 1, 2))
    out = out.reshape(mc_samples, -1, out.shape[1], h, w)
    loc, log_scale = jnp.split(out, 2, axis=2)
    return loc, log_scale


# ---------------------------------------------------------------------------
if __name__ == "__main__":
    key = jax.random.PRNGKey(0)
    k_param, k_x, k_ctx = jax.random.split(key, 3)

    MC, B, C, CC, H, W, HIDDEN = 2, 2, 4, 3, 16, 16, 32
    params = make_params(C, CC, HIDDEN, k_param)

    # 5-D input exercises the MC-sample reshape branch of forward().
    x = jax.random.normal(k_x, (MC, B, C, H, W), jnp.float32)
    context = jax.random.normal(k_ctx, (MC * B, CC, H, W), jnp.float32)

    fwd = jax.jit(functools.partial(autoregressive_model_forward, params))

    loc, log_scale = fwd(x, context)
    jax.block_until_ready((loc, log_scale))
    assert loc.shape == (MC, B, C, H, W), loc.shape
    assert log_scale.shape == (MC, B, C, H, W), log_scale.shape

    # Numerical check vs. pure-JAX f32 reference (kernel uses bf16 operands).
    ref_loc, ref_ls = _reference_forward(params, x, context)
    assert jnp.allclose(loc, ref_loc, rtol=5e-2, atol=5e-2)
    assert jnp.allclose(log_scale, ref_ls, rtol=5e-2, atol=5e-2)

    # Context-free path: dedicated kernel variant without the ctx operand/matmul.
    loc_nc, ls_nc = fwd(x, None)
    jax.block_until_ready((loc_nc, ls_nc))
    assert loc_nc.shape == (MC, B, C, H, W)
    ref_loc_nc, ref_ls_nc = _reference_forward(params, x)
    assert jnp.allclose(loc_nc, ref_loc_nc, rtol=5e-2, atol=5e-2)
    assert jnp.allclose(ls_nc, ref_ls_nc, rtol=5e-2, atol=5e-2)

    print("KERNEL_OK")
</pallas_src>

<mosaic_0001>
module attributes {stable_mosaic.version = 11 : i64} {
  func.func @_ar_conv_kernel_ctx(%arg0: i32, %arg1: memref<1x7x806xbf16, #tpu.memory_space<vmem>>, %arg2: memref<9x32x4xbf16, #tpu.memory_space<vmem>>, %arg3: memref<32x3xbf16, #tpu.memory_space<vmem>>, %arg4: memref<32x1xf32, #tpu.memory_space<vmem>>, %arg5: memref<8x32xbf16, #tpu.memory_space<vmem>>, %arg6: memref<8x1xf32, #tpu.memory_space<vmem>>, %arg7: memref<8x768xf32, #tpu.memory_space<vmem>>) attributes {dimension_semantics = [#tpu.dimension_semantics<parallel>], iteration_bounds = array<i64: 2>, scalar_prefetch = 0 : i64, scratch_operands = 0 : i64, tpu.core_type = #tpu.core_type<tc>, window_params = [{transform_indices = @transform_0, window_bounds = array<i64: 1, 7, 806>}, {pipeline_mode = #tpu.pipeline_mode<synchronous>, transform_indices = @transform_1, window_bounds = array<i64: 9, 32, 4>}, {pipeline_mode = #tpu.pipeline_mode<synchronous>, transform_indices = @transform_2, window_bounds = array<i64: 32, 3>}, {pipeline_mode = #tpu.pipeline_mode<synchronous>, transform_indices = @transform_3, window_bounds = array<i64: 32, 1>}, {pipeline_mode = #tpu.pipeline_mode<synchronous>, transform_indices = @transform_4, window_bounds = array<i64: 8, 32>}, {pipeline_mode = #tpu.pipeline_mode<synchronous>, transform_indices = @transform_5, window_bounds = array<i64: 8, 1>}, {transform_indices = @transform_6, window_bounds = array<i64: 8, 768>}]} {
    %c0 = arith.constant 0 : index
    %c0_0 = arith.constant 0 : index
    %c0_1 = arith.constant 0 : index
    %0 = vector.load %arg1[%c0, %c0_0, %c0_1] : memref<1x7x806xbf16, #tpu.memory_space<vmem>>, vector<1x7x806xbf16>
    %1 = vector.shape_cast %0 : vector<1x7x806xbf16> to vector<7x806xbf16>
    %cst = arith.constant 0.000000e+00 : f32
    %2 = vector.broadcast %cst : f32 to vector<32x768xf32>
    %c0_2 = arith.constant 0 : index
    %c0_3 = arith.constant 0 : index
    %c0_4 = arith.constant 0 : index
    %3 = vector.load %arg2[%c0_2, %c0_3, %c0_4] : memref<9x32x4xbf16, #tpu.memory_space<vmem>>, vector<1x32x4xbf16>
    %4 = vector.shape_cast %3 : vector<1x32x4xbf16> to vector<32x4xbf16>
    %5 = vector.extract_strided_slice %1 {offsets = [0, 0], sizes = [4, 768], strides = [1, 1]} : vector<7x806xbf16> to vector<4x768xbf16>
    %cst_5 = arith.constant dense<0.000000e+00> : vector<32x768xf32>
    %6 = tpu.matmul %4, %5, %cst_5 {dimension_numbers = #tpu.dot_dimension_numbers<[1], [0], [0], [1], [0, 0, 1, 1], [], []>} : vector<32x4xbf16>, vector<4x768xbf16>, vector<32x768xf32> -> vector<32x768xf32>
    %7 = arith.addf %2, %6 : vector<32x768xf32>
    %c1 = arith.constant 1 : index
    %c0_6 = arith.constant 0 : index
    %c0_7 = arith.constant 0 : index
    %8 = vector.load %arg2[%c1, %c0_6, %c0_7] : memref<9x32x4xbf16, #tpu.memory_space<vmem>>, vector<1x32x4xbf16>
    %9 = vector.shape_cast %8 : vector<1x32x4xbf16> to vector<32x4xbf16>
    %10 = vector.extract_strided_slice %1 {offsets = [0, 1], sizes = [4, 768], strides = [1, 1]} : vector<7x806xbf16> to vector<4x768xbf16>
    %cst_8 = arith.constant dense<0.000000e+00> : vector<32x768xf32>
    %11 = tpu.matmul %9, %10, %cst_8 {dimension_numbers = #tpu.dot_dimension_numbers<[1], [0], [0], [1], [0, 0, 1, 1], [], []>} : vector<32x4xbf16>, vector<4x768xbf16>, vector<32x768xf32> -> vector<32x768xf32>
    %12 = arith.addf %7, %11 : vector<32x768xf32>
    %c2 = arith.constant 2 : index
    %c0_9 = arith.constant 0 : index
    %c0_10 = arith.constant 0 : index
    %13 = vector.load %arg2[%c2, %c0_9, %c0_10] : memref<9x32x4xbf16, #tpu.memory_space<vmem>>, vector<1x32x4xbf16>
    %14 = vector.shape_cast %13 : vector<1x32x4xbf16> to vector<32x4xbf16>
    %15 = vector.extract_strided_slice %1 {offsets = [0, 2], sizes = [4, 768], strides = [1, 1]} : vector<7x806xbf16> to vector<4x768xbf16>
    %cst_11 = arith.constant dense<0.000000e+00> : vector<32x768xf32>
    %16 = tpu.matmul %14, %15, %cst_11 {dimension_numbers = #tpu.dot_dimension_numbers<[1], [0], [0], [1], [0, 0, 1, 1], [], []>} : vector<32x4xbf16>, vector<4x768xbf16>, vector<32x768xf32> -> vector<32x768xf32>
    %17 = arith.addf %12, %16 : vector<32x768xf32>
    %c3 = arith.constant 3 : index
    %c0_12 = arith.constant 0 : index
    %c0_13 = arith.constant 0 : index
    %18 = vector.load %arg2[%c3, %c0_12, %c0_13] : memref<9x32x4xbf16, #tpu.memory_space<vmem>>, vector<1x32x4xbf16>
    %19 = vector.shape_cast %18 : vector<1x32x4xbf16> to vector<32x4xbf16>
    %20 = vector.extract_strided_slice %1 {offsets = [0, 18], sizes = [4, 768], strides = [1, 1]} : vector<7x806xbf16> to vector<4x768xbf16>
    %cst_14 = arith.constant dense<0.000000e+00> : vector<32x768xf32>
    %21 = tpu.matmul %19, %20, %cst_14 {dimension_numbers = #tpu.dot_dimension_numbers<[1], [0], [0], [1], [0, 0, 1, 1], [], []>} : vector<32x4xbf16>, vector<4x768xbf16>, vector<32x768xf32> -> vector<32x768xf32>
    %22 = arith.addf %17, %21 : vector<32x768xf32>
    %c4 = arith.constant 4 : index
    %c0_15 = arith.constant 0 : index
    %c0_16 = arith.constant 0 : index
    %23 = vector.load %arg2[%c4, %c0_15, %c0_16] : memref<9x32x4xbf16, #tpu.memory_space<vmem>>, vector<1x32x4xbf16>
    %24 = vector.shape_cast %23 : vector<1x32x4xbf16> to vector<32x4xbf16>
    %25 = vector.extract_strided_slice %1 {offsets = [0, 19], sizes = [4, 768], strides = [1, 1]} : vector<7x806xbf16> to vector<4x768xbf16>
    %cst_17 = arith.constant dense<0.000000e+00> : vector<32x768xf32>
    %26 = tpu.matmul %24, %25, %cst_17 {dimension_numbers = #tpu.dot_dimension_numbers<[1], [0], [0], [1], [0, 0, 1, 1], [], []>} : vector<32x4xbf16>, vector<4x768xbf16>, vector<32x768xf32> -> vector<32x768xf32>
    %27 = arith.addf %22, %26 : vector<32x768xf32>
    %c5 = arith.constant 5 : index
    %c0_18 = arith.constant 0 : index
    %c0_19 = arith.constant 0 : index
    %28 = vector.load %arg2[%c5, %c0_18, %c0_19] : memref<9x32x4xbf16, #tpu.memory_space<vmem>>, vector<1x32x4xbf16>
    %29 = vector.shape_cast %28 : vector<1x32x4xbf16> to vector<32x4xbf16>
    %30 = vector.extract_strided_slice %1 {offsets = [0, 20], sizes = [4, 768], strides = [1, 1]} : vector<7x806xbf16> to vector<4x768xbf16>
    %cst_20 = arith.constant dense<0.000000e+00> : vector<32x768xf32>
    %31 = tpu.matmul %29, %30, %cst_20 {dimension_numbers = #tpu.dot_dimension_numbers<[1], [0], [0], [1], [0, 0, 1, 1], [], []>} : vector<32x4xbf16>, vector<4x768xbf16>, vector<32x768xf32> -> vector<32x768xf32>
    %32 = arith.addf %27, %31 : vector<32x768xf32>
    %c6 = arith.constant 6 : index
    %c0_21 = arith.constant 0 : index
    %c0_22 = arith.constant 0 : index
    %33 = vector.load %arg2[%c6, %c0_21, %c0_22] : memref<9x32x4xbf16, #tpu.memory_space<vmem>>, vector<1x32x4xbf16>
    %34 = vector.shape_cast %33 : vector<1x32x4xbf16> to vector<32x4xbf16>
    %35 = vector.extract_strided_slice %1 {offsets = [0, 36], sizes = [4, 768], strides = [1, 1]} : vector<7x806xbf16> to vector<4x768xbf16>
    %cst_23 = arith.constant dense<0.000000e+00> : vector<32x768xf32>
    %36 = tpu.matmul %34, %35, %cst_23 {dimension_numbers = #tpu.dot_dimension_numbers<[1], [0], [0], [1], [0, 0, 1, 1], [], []>} : vector<32x4xbf16>, vector<4x768xbf16>, vector<32x768xf32> -> vector<32x768xf32>
    %37 = arith.addf %32, %36 : vector<32x768xf32>
    %c7 = arith.constant 7 : index
    %c0_24 = arith.constant 0 : index
    %c0_25 = arith.constant 0 : index
    %38 = vector.load %arg2[%c7, %c0_24, %c0_25] : memref<9x32x4xbf16, #tpu.memory_space<vmem>>, vector<1x32x4xbf16>
    %39 = vector.shape_cast %38 : vector<1x32x4xbf16> to vector<32x4xbf16>
    %40 = vector.extract_strided_slice %1 {offsets = [0, 37], sizes = [4, 768], strides = [1, 1]} : vector<7x806xbf16> to vector<4x768xbf16>
    %cst_26 = arith.constant dense<0.000000e+00> : vector<32x768xf32>
    %41 = tpu.matmul %39, %40, %cst_26 {dimension_numbers = #tpu.dot_dimension_numbers<[1], [0], [0], [1], [0, 0, 1, 1], [], []>} : vector<32x4xbf16>, vector<4x768xbf16>, vector<32x768xf32> -> vector<32x768xf32>
    %42 = arith.addf %37, %41 : vector<32x768xf32>
    %c8 = arith.constant 8 : index
    %c0_27 = arith.constant 0 : index
    %c0_28 = arith.constant 0 : index
    %43 = vector.load %arg2[%c8, %c0_27, %c0_28] : memref<9x32x4xbf16, #tpu.memory_space<vmem>>, vector<1x32x4xbf16>
    %44 = vector.shape_cast %43 : vector<1x32x4xbf16> to vector<32x4xbf16>
    %45 = vector.extract_strided_slice %1 {offsets = [0, 38], sizes = [4, 768], strides = [1, 1]} : vector<7x806xbf16> to vector<4x768xbf16>
    %cst_29 = arith.constant dense<0.000000e+00> : vector<32x768xf32>
    %46 = tpu.matmul %44, %45, %cst_29 {dimension_numbers = #tpu.dot_dimension_numbers<[1], [0], [0], [1], [0, 0, 1, 1], [], []>} : vector<32x4xbf16>, vector<4x768xbf16>, vector<32x768xf32> -> vector<32x768xf32>
    %47 = arith.addf %42, %46 : vector<32x768xf32>
    %c0_30 = arith.constant 0 : index
    %c0_31 = arith.constant 0 : index
    %48 = vector.load %arg3[%c0_30, %c0_31] : memref<32x3xbf16, #tpu.memory_space<vmem>>, vector<32x3xbf16>
    %49 = vector.extract_strided_slice %1 {offsets = [4, 19], sizes = [3, 768], strides = [1, 1]} : vector<7x806xbf16> to vector<3x768xbf16>
    %cst_32 = arith.constant dense<0.000000e+00> : vector<32x768xf32>
    %50 = tpu.matmul %48, %49, %cst_32 {dimension_numbers = #tpu.dot_dimension_numbers<[1], [0], [0], [1], [0, 0, 1, 1], [], []>} : vector<32x3xbf16>, vector<3x768xbf16>, vector<32x768xf32> -> vector<32x768xf32>
    %51 = arith.addf %47, %50 : vector<32x768xf32>
    %c0_33 = arith.constant 0 : index
    %c0_34 = arith.constant 0 : index
    %52 = vector.load %arg4[%c0_33, %c0_34] : memref<32x1xf32, #tpu.memory_space<vmem>>, vector<32x1xf32>
    %53 = vector.broadcast %52 : vector<32x1xf32> to vector<32x768xf32>
    %54 = arith.addf %51, %53 : vector<32x768xf32>
    %cst_35 = arith.constant 0.000000e+00 : f32
    %55 = vector.broadcast %cst_35 : f32 to vector<32x768xf32>
    %56 = arith.maximumf %54, %55 : vector<32x768xf32>
    %57 = arith.truncf %56 : vector<32x768xf32> to vector<32x768xbf16>
    %c0_36 = arith.constant 0 : index
    %c0_37 = arith.constant 0 : index
    %58 = vector.load %arg5[%c0_36, %c0_37] : memref<8x32xbf16, #tpu.memory_space<vmem>>, vector<8x32xbf16>
    %cst_38 = arith.constant dense<0.000000e+00> : vector<8x768xf32>
    %59 = tpu.matmul %58, %57, %cst_38 {dimension_numbers = #tpu.dot_dimension_numbers<[1], [0], [0], [1], [0, 0, 1, 1], [], []>} : vector<8x32xbf16>, vector<32x768xbf16>, vector<8x768xf32> -> vector<8x768xf32>
    %c0_39 = arith.constant 0 : index
    %c0_40 = arith.constant 0 : index
    %60 = vector.load %arg6[%c0_39, %c0_40] : memref<8x1xf32, #tpu.memory_space<vmem>>, vector<8x1xf32>
    %61 = vector.broadcast %60 : vector<8x1xf32> to vector<8x768xf32>
    %62 = arith.addf %59, %61 : vector<8x768xf32>
    %c0_41 = arith.constant 0 : index
    %c0_42 = arith.constant 0 : index
    %63 = vector.load %arg7[%c0_41, %c0_42] : memref<8x768xf32, #tpu.memory_space<vmem>>, vector<8x768xf32>
    tpu.vector_store %arg7[%c0_41, %c0_42], %62 {strides = array<i32>} : memref<8x768xf32, #tpu.memory_space<vmem>>, vector<8x768xf32>,
    return
  }
  func.func @transform_0(%arg0: i32) -> (i32, i32, i32) {
    %c0_i32 = arith.constant 0 : i32
    %c0_i32_0 = arith.constant 0 : i32
    %c0_i32_1 = arith.constant 0 : i32
    return %arg0, %c0_i32, %c0_i32_0 : i32, i32, i32
  }
  func.func @transform_1(%arg0: i32) -> (i32, i32, i32) {
    %c0_i32 = arith.constant 0 : i32
    %c0_i32_0 = arith.constant 0 : i32
    %c0_i32_1 = arith.constant 0 : i32
    %c0_i32_2 = arith.constant 0 : i32
    return %c0_i32, %c0_i32_0, %c0_i32_1 : i32, i32, i32
  }
  func.func @transform_2(%arg0: i32) -> (i32, i32) {
    %c0_i32 = arith.constant 0 : i32
    %c0_i32_0 = arith.constant 0 : i32
    %c0_i32_1 = arith.constant 0 : i32
    return %c0_i32, %c0_i32_0 : i32, i32
  }
  func.func @transform_3(%arg0: i32) -> (i32, i32) {
    %c0_i32 = arith.constant 0 : i32
    %c0_i32_0 = arith.constant 0 : i32
    %c0_i32_1 = arith.constant 0 : i32
    return %c0_i32, %c0_i32_0 : i32, i32
  }
  func.func @transform_4(%arg0: i32) -> (i32, i32) {
    %c0_i32 = arith.constant 0 : i32
    %c0_i32_0 = arith.constant 0 : i32
    %c0_i32_1 = arith.constant 0 : i32
    return %c0_i32, %c0_i32_0 : i32, i32
  }
  func.func @transform_5(%arg0: i32) -> (i32, i32) {
    %c0_i32 = arith.constant 0 : i32
    %c0_i32_0 = arith.constant 0 : i32
    %c0_i32_1 = arith.constant 0 : i32
    return %c0_i32, %c0_i32_0 : i32, i32
  }
  func.func @transform_6(%arg0: i32) -> (i32, i32) {
    %c0_i32 = arith.constant 0 : i32
    %c0_i32_0 = arith.constant 0 : i32
    return %c0_i32, %arg0 : i32, i32
  }
}

</mosaic_0001>

<bundles_post_ra>
// kernel: autoregressive_model_forward.1
= control target key start
LH: loop header
LB: loop body
LE: loop exit
PB: predicated region body
PF: predicated region fallthrough
CT: control target
= control target key end

     0   :  { %s3402_s21 = smov 0   ;;  %s4045_s0 = inlined_call_operand.vmem [shape: bf16[2,7,806], index: 0, kind: input, shape index: {}]   ;;  %s4046_s1 = inlined_call_operand.vmem [shape: bf16[9,32,4], index: 1, kind: input, shape index: {}]   ;;  %s4047_s2 = inlined_call_operand.vmem [shape: bf16[32,3], index: 2, kind: input, shape index: {}]   ;;  %s4048_s3 = inlined_call_operand.vmem [shape: f32[32,1], index: 3, kind: input, shape index: {}]   ;;  %s4049_s4 = inlined_call_operand.vmem [shape: bf16[8,32], index: 4, kind: input, shape index: {}]   ;;  %s4050_s5 = inlined_call_operand.vmem [shape: f32[8,1], index: 5, kind: input, shape index: {}]   ;;  %s4051_s6 = inlined_call_operand.vmem [shape: f32[8,1536], index: 6, kind: output, shape index: {}]  }
   0x1 LB: > { %s3408_s22 = sadd.s32 4294967295, %s3355_s21   ;;  %p2931_p0 = scmp.ge.s32.totalorder %s3355_s21, 1  ;;  %s3355_s21 = sphi %s3402_s21, %s16_s21  }
   0x2   : > { %p212_p1 = scmp.lt.s32.totalorder %s3355_s21, 3 }
   0x4   : > { %p213_p2 = pnand %p2931_p0, %p212_p1 }
   0x5   : > { %p242_p3 = scmp.lt.s32.totalorder (!%p213_p2), %s3408_s22, 1  ;;  %v3357_v0 = vmov (!%p213_p2), 0   ;;  %s3358_s28 = smov (!%p213_p2), 126   ;;  %vm723_vm0 = vcmask (!%p213_p2), 1031168   ;;  %vm323_vm1 = vcmask (!%p213_p2), 1041408   ;;  %v3534_v24 = vld [vmem:[%s4046_s1 + $0x20] sm:$0xff] (!%p213_p2)  }
   0x6   : > { %216 = sbr.rel (%p213_p2) target bundleno = 836 (0x344), region = 44  ;;  %786 = vmatprep.mubr.bf16.mxu0 (!%p213_p2), %v3357_v0  ;;  %374 = vmatprep.mubr.bf16.mxu1 (!%p213_p2), %v3357_v0  ;;  %s3359_s29 = smov (!%p213_p2), 127   ;;  %vm316_vm2 = vcmask (!%p213_p2), 31744   ;;  %vm309_vm3 = vcmask (!%p213_p2), 1039360   ;;  %v3552_v34 = vld [vmem:[%s4046_s1 + $0x28] sm:$0xff] (!%p213_p2)   ;;  %vm966_vm4 = vcmask (!%p213_p2), 900096  }
   0x7   : > { %3320 = vset.pattern.permute.xlu1 (!%p213_p2), %v3357_v0  ;;  %3321 = vset.pattern.permute.xlu0 (!%p213_p2), %v3357_v0  ;;  %s3360_s30 = smov (!%p213_p2), 110   ;;  %s3361_s7 = smov (!%p213_p2), 109   ;;  %v3562_v39 = vld [vmem:[%s4046_s1 + $0x10] sm:$0xff] (!%p213_p2)   ;;  %v3332_v50 = vld [vmem:[%s4046_s1 + $0x18] sm:$0xff] (!%p213_p2)   ;;  %vm1209_vm5 = vcmask (!%p213_p2), 891904   ;;  %vm1452_vm6 = vcmask (!%p213_p2), 883712  }
   0x8   : > { %s3362_s8 = smov (!%p213_p2), 108   ;;  %s3363_s9 = smov (!%p213_p2), 92   ;;  %v3605_v62 = vld [vmem:[%s4046_s1 + $0x30] sm:$0xff] (!%p213_p2)   ;;  %vm1695_vm7 = vcmask (!%p213_p2), 752640   ;;  %vm1938_vm8 = vcmask (!%p213_p2), 744448   ;;  %vm2181_vm9 = vcmask (!%p213_p2), 736256  }
   0x9   : > { %s3364_s10 = smov (!%p213_p2), 91   ;;  %s3365_s11 = smov (!%p213_p2), 90   ;;  %vm2443_vm10 = vcmask (!%p213_p2), 1040384   ;;  %vm2436_vm11 = vcmask (!%p213_p2), 23552   ;;  %vm2738_vm12 = vcmask (!%p213_p2), 261120  }
   0xa   : > { %s247_s20 = smul.u32 (!%p213_p2), 6, %s3408_s22 }
   0xc   : > { %p248_p4 = scmp.lt.s32.totalorder (!%p213_p2), %s247_s20, 11 }
   0xd   : > { %s243_s23 = scalar_select %p242_p3, %s3408_s22, 1 }
   0xe   : > { %s4053_s20 = smov (!%p248_p4, %s247_s20), 11 }
   0xf   : > { %s3301_s24 = smul.u32 28, %s243_s23  ;;  %s2933_s23 = sshll.u32 %s4053_s20, 3 }
  0x10   : > { %s251_s26 = scalar_lea.vmem %s4051_s6, %s2933_s23 }
  0x11   : > { %s246_s27 = scalar_lea.vmem %s4045_s0, %s3301_s24 }
  0x12   : > { %v255_v1 = vld [vmem:[%s246_s27 + $0x8] sm:$0xff]  ;;  %v254_v2 = vld [vmem:[%s246_s27] sm:$0xff]  ;;  %v256_v3 = vld [vmem:[%s246_s27 + $0x10] sm:$0xff] }
  0x13   : > { %v3421_v4 = vcombine.low %v255_v1, %v255_v1  ;;  %v3423_v5 = vcombine.low %v254_v2, %v254_v2  ;;  %v3429_v6 = vcombine.low %v256_v3, %v256_v3  ;;  %v3431_v7 = vcombine.high %v254_v2, %v254_v2  ;;  %v3433_v8 = vld [vmem:[%s246_s27 + $0x18] ss:$0 sps:$4 sm:$0xff]  }
  0x14   : > { %v3439_v9 = vcombine.high %v256_v3, %v256_v3  ;;  %v3454_v10 = vcombine.high %v255_v1, %v255_v1  ;;  %v2415_v27 = vrot.slane %v3433_v8, 2 }
  0x15   : > { %713 = vrot.lane.b32.xlu1 %v3421_v4, %s3358_s28  ;;  %709 = vrot.lane.b32.xlu0 %v3423_v5, %s3358_s28  ;;  %v2410_v11 = vrot.slane %v3431_v7, 2  ;;  %v2411_v12 = vrot.slane %v3421_v4, 2  ;;  %v2409_v13 = vrot.slane %v3423_v5, 2  ;;  %v2413_v17 = vrot.slane %v3429_v6, 2 }
  0x16   : > { %v2412_v14 = vrot.slane %v3454_v10, 2  ;;  %v2414_v18 = vrot.slane %v3439_v9, 2 }
  0x19   : > { %717 = vrot.lane.b32.xlu1 %v3429_v6, %s3358_s28  ;;  %711 = vrot.lane.b32.xlu0 %v3431_v7, %s3358_s28 }
  0x1d   : > { %721 = vrot.lane.b32.xlu1 %v3433_v8, %s3358_s28  ;;  %719 = vrot.lane.b32.xlu0 %v3439_v9, %s3358_s28 }
  0x21   : > { %297 = vrot.lane.b32.xlu1 %v3431_v7, %s3359_s29  ;;  %295 = vrot.lane.b32.xlu0 %v3423_v5, %s3359_s29 }
  0x25   : > { %952 = vrot.lane.b32.xlu1 %v3423_v5, %s3360_s30  ;;  %299 = vrot.lane.b32.xlu0 %v3421_v4, %s3359_s29 }
  0x29   : > { %956 = vrot.lane.b32.xlu1 %v3421_v4, %s3360_s30  ;;  %954 = vrot.lane.b32.xlu0 %v3431_v7, %s3360_s30 }
  0x2d   : > { %303 = vrot.lane.b32.xlu1 %v3429_v6, %s3359_s29  ;;  %301 = vrot.lane.b32.xlu0 %v3454_v10, %s3359_s29 }
  0x31   : > { %962 = vrot.lane.b32.xlu1 %v3439_v9, %s3360_s30  ;;  %960 = vrot.lane.b32.xlu0 %v3429_v6, %s3360_s30 }
  0x35   : > { %305 = vrot.lane.b32.xlu1 %v3439_v9, %s3359_s29  ;;  %964 = vrot.lane.b32.xlu0 %v3433_v8, %s3360_s30 }
  0x39   : > { %1195 = vrot.lane.b32.xlu1 %v3423_v5, %s3361_s7  ;;  %307 = vrot.lane.b32.xlu0 %v3433_v8, %s3359_s29 }
  0x3d   : > { %1199 = vrot.lane.b32.xlu1 %v3421_v4, %s3361_s7  ;;  %1197 = vrot.lane.b32.xlu0 %v3431_v7, %s3361_s7 }
  0x41   : > { %1205 = vrot.lane.b32.xlu1 %v3439_v9, %s3361_s7  ;;  %1203 = vrot.lane.b32.xlu0 %v3429_v6, %s3361_s7 }
  0x45   : > { %1438 = vrot.lane.b32.xlu1 %v3423_v5, %s3362_s8  ;;  %1207 = vrot.lane.b32.xlu0 %v3433_v8, %s3361_s7 }
  0x49   : > { %1442 = vrot.lane.b32.xlu1 %v3421_v4, %s3362_s8  ;;  %1440 = vrot.lane.b32.xlu0 %v3431_v7, %s3362_s8 }
  0x4d   : > { %1448 = vrot.lane.b32.xlu1 %v3439_v9, %s3362_s8  ;;  %1446 = vrot.lane.b32.xlu0 %v3429_v6, %s3362_s8 }
  0x51   : > { %715 = vrot.lane.b32.xlu1 %v3454_v10, %s3358_s28  ;;  %1450 = vrot.lane.b32.xlu0 %v3433_v8, %s3362_s8 }
  0x55   : > { %1683 = vrot.lane.b32.xlu1 %v3431_v7, %s3363_s9  ;;  %1681 = vrot.lane.b32.xlu0 %v3423_v5, %s3363_s9 }
  0x59   : > { %958 = vrot.lane.b32.xlu1 %v3454_v10, %s3360_s30  ;;  %1685 = vrot.lane.b32.xlu0 %v3421_v4, %s3363_s9 }
  0x5d   : > { %1691 = vrot.lane.b32.xlu1 %v3439_v9, %s3363_s9  ;;  %1689 = vrot.lane.b32.xlu0 %v3429_v6, %s3363_s9 }
  0x61   : > { %1201 = vrot.lane.b32.xlu1 %v3454_v10, %s3361_s7  ;;  %1693 = vrot.lane.b32.xlu0 %v3433_v8, %s3363_s9 }
  0x65   : > { %1926 = vrot.lane.b32.xlu1 %v3431_v7, %s3364_s10  ;;  %1924 = vrot.lane.b32.xlu0 %v3423_v5, %s3364_s10 }
  0x69   : > { %1444 = vrot.lane.b32.xlu1 %v3454_v10, %s3362_s8  ;;  %1928 = vrot.lane.b32.xlu0 %v3421_v4, %s3364_s10 }
  0x6d   : > { %1934 = vrot.lane.b32.xlu1 %v3439_v9, %s3364_s10  ;;  %1932 = vrot.lane.b32.xlu0 %v3429_v6, %s3364_s10 }
  0x71   : > { %1687 = vrot.lane.b32.xlu1 %v3454_v10, %s3363_s9  ;;  %1936 = vrot.lane.b32.xlu0 %v3433_v8, %s3364_s10 }
  0x75   : > { %2169 = vrot.lane.b32.xlu1 %v3431_v7, %s3365_s11  ;;  %2167 = vrot.lane.b32.xlu0 %v3423_v5, %s3365_s11 }
  0x79   : > { %1930 = vrot.lane.b32.xlu1 %v3454_v10, %s3364_s10  ;;  %2171 = vrot.lane.b32.xlu0 %v3421_v4, %s3365_s11 }
  0x7d   : > { %2177 = vrot.lane.b32.xlu1 %v3439_v9, %s3365_s11  ;;  %2175 = vrot.lane.b32.xlu0 %v3429_v6, %s3365_s11 }
  0x81   : > { %2173 = vrot.lane.b32.xlu1 %v3454_v10, %s3365_s11  ;;  %2179 = vrot.lane.b32.xlu0 %v3433_v8, %s3365_s11 }
  0x85   : > { %2418 = vrot.lane.b32.xlu0 %v2410_v11, %s3361_s7  ;;  %2420 = vrot.lane.b32.xlu1 %v2411_v12, %s3361_s7  ;;  %v3623_v11 = vld [vmem:[%s4046_s1 + $0x38] sm:$0xff]  }
  0x87   : > { %v3518_v15 = vpop.permute.xlu1 %713  ;;  %v710_v16 = vpop.permute.xlu0 %709 }
  0x89   : > { %2416 = vrot.lane.b32.xlu0 %v2409_v13, %s3361_s7  ;;  %2422 = vrot.lane.b32.xlu1 %v2412_v14, %s3361_s7  ;;  %v518_v14 = vsel %vm323_vm1, %v3423_v5, 0 }
  0x8b   : > { %v3524_v19 = vpop.permute.xlu1 %717  ;;  %v712_v20 = vpop.permute.xlu0 %711 }
  0x8c   : > { %v725_v21 = vsel %vm723_vm0, %v712_v20, %v3518_v15  ;;  %v724_v22 = vsel %vm723_vm0, %v710_v16, %v712_v20 }
  0x8d   : > { %2973 = vmatprep.subr.msk.bf16.mxu0 %vm323_vm1, %v725_v21  ;;  %v737_v23 = vsel %vm323_vm1, %v724_v22, 0  ;;  %2424 = vrot.lane.b32.xlu0 %v2413_v17, %s3361_s7 }
  0x8e   : > { %755 = vmatpush1.bf16.msra.mxu0 %v737_v23  ;;  %2426 = vrot.lane.b32.xlu1 %v2414_v18, %s3361_s7 }
  0x8f   : > { %v722_v25 = vpop.permute.xlu1 %721  ;;  %v720_v26 = vpop.permute.xlu0 %719 }
  0x90   : > { %v728_v28 = vsel %vm723_vm0, %v3524_v19, %v720_v26  ;;  %v729_v29 = vsel %vm723_vm0, %v720_v26, %v722_v25  ;;  %v3335_v25 = vld [vmem:[%s4046_s1] sm:$0xff]  }
  0x91   : > { %v749_v30 = vsel %vm323_vm1, %v728_v28, 0  ;;  %2974 = vmatmul.mubr.msk.bf16.vlgmr.msra.gmra.mrb[0].mxu0 %vm316_vm2, %v3534_v24  ;;  %2979 = vmatprep.subr.msk.bf16.mxu0 %vm323_vm1, %v729_v29  ;;  %v3675_v29 = vld [vmem:[%s4046_s1 + $0x40] sm:$0xff]  }
  0x92   : > { %861 = vmatpush1.bf16.msra.mxu0 %v749_v30  ;;  %796 = vmatprep.mubr.bf16.mxu0 %v3357_v0 }
  0x93   : > { %v298_v31 = vpop.permute.xlu1 %297  ;;  %v296_v32 = vpop.permute.xlu0 %295  ;;  %2428 = vrot.lane.b32.xlu0 %v2415_v27, %s3361_s7 }
  0x94   : > { %v310_v33 = vsel %vm309_vm3, %v296_v32, %v298_v31 }
  0x95   : > { %v325_v37 = vsel %vm323_vm1, %v310_v33, 0  ;;  %v3337_v33 = vld [vmem:[%s4046_s1 + $0x8] sm:$0xff]  }
  0x97   : > { %v953_v35 = vpop.permute.xlu1 %952  ;;  %v300_v36 = vpop.permute.xlu0 %299 }
  0x98   : > { %v311_v38 = vsel %vm309_vm3, %v298_v31, %v300_v36 }
  0x99   : > { %2947 = vmatprep.subr.msk.bf16.mxu1 %vm323_vm1, %v311_v38  ;;  %2975 = vmatmul.mubr.msk.bf16.gmra.mrb[4].mxu0 %vm316_vm2, %v3552_v34  ;;  %v530_v38 = vsel %vm323_vm1, %v3429_v6, 0 }
  0x9a   : > { %343 = vmatpush1.bf16.msra.mxu1 %v325_v37  ;;  %892 = vmatprep.mubr.bf16.mxu0 %v3357_v0 }
  0x9b   : > { %v3565_v40 = vpop.permute.xlu1 %956  ;;  %v955_v41 = vpop.permute.xlu0 %954 }
  0x9c   : > { %v967_v42 = vsel %vm966_vm4, %v953_v35, %v955_v41  ;;  %v968_v43 = vsel %vm966_vm4, %v955_v41, %v3565_v40 }
  0x9d   : > { %2948 = vmatmul.mubr.msk.bf16.vlgmr.msra.gmra.mrb[0].mxu1 %vm316_vm2, %v3562_v39  ;;  %2988 = vmatprep.subr.msk.bf16.mxu0 %vm323_vm1, %v968_v43  ;;  %v980_v44 = vsel %vm323_vm1, %v967_v42, 0 }
  0x9e   : > { %384 = vmatprep.mubr.bf16.mxu1 %v3357_v0 }
  0x9f   : > { %v304_v45 = vpop.permute.xlu1 %303  ;;  %v302_v46 = vpop.permute.xlu0 %301 }
  0xa0   : > { %v312_v47 = vsel %vm309_vm3, %v300_v36, %v302_v46  ;;  %v313_v48 = vsel %vm309_vm3, %v302_v46, %v304_v45 }
  0xa1   : > { %v331_v49 = vsel %vm323_vm1, %v312_v47, 0  ;;  %2950 = vmatprep.subr.msk.bf16.mxu1 %vm323_vm1, %v313_v48  ;;  %2980 = vmatmul.mubr.msk.bf16.vlgmr.msra.gmra.mrb[8].mxu0 %vm316_vm2, %v3534_v24  ;;  %v3739_v47 = vld [vmem:[%s4046_s1 + $0x50] sm:$0xff]  }
  0xa2   : > { %396 = vmatpush1.bf16.msra.mxu1 %v331_v49  ;;  %998 = vmatpush1.bf16.msra.mxu0 %v980_v44 }
  0xa3   : > { %v963_v51 = vpop.permute.xlu1 %962  ;;  %v3584_v52 = vpop.permute.xlu0 %960  ;;  %902 = vmatprep.mubr.bf16.mxu0 %v3357_v0 }
  0xa4   : > { %v971_v60 = vsel %vm966_vm4, %v3584_v52, %v963_v51 }
  0xa5   : > { %2949 = vmatmul.mubr.msk.bf16.gmra.mrb[4].mxu1 %vm316_vm2, %v3332_v50  ;;  %v992_v63 = vsel %vm323_vm1, %v971_v60, 0 }
  0xa6   : > { %427 = vmatprep.mubr.bf16.mxu1 %v3357_v0 }
  0xa7   : > { %v306_v53 = vpop.permute.xlu1 %305  ;;  %v965_v54 = vpop.permute.xlu0 %964 }
  0xa8   : > { %v314_v55 = vsel %vm309_vm3, %v304_v45, %v306_v53  ;;  %v972_v56 = vsel %vm966_vm4, %v963_v51, %v965_v54  ;;  %v3757_v51 = vld [vmem:[%s4046_s1 + $0x58] sm:$0xff]  }
  0xa9   : > { %2981 = vmatmul.mubr.msk.bf16.gmra.mrb[12].mxu0 %vm316_vm2, %v3552_v34  ;;  %2994 = vmatprep.subr.msk.bf16.mxu0 %vm323_vm1, %v972_v56  ;;  %v337_v57 = vsel %vm323_vm1, %v314_v55, 0 }
  0xaa   : > { %1029 = vmatprep.mubr.bf16.mxu0 %v3357_v0 }
  0xab   : > { %v1196_v58 = vpop.permute.xlu1 %1195  ;;  %v308_v59 = vpop.permute.xlu0 %307 }
  0xac   : > { %v315_v61 = vsel %vm309_vm3, %v306_v53, %v308_v59 }
  0xad   : > { %2951 = vmatmul.mubr.msk.bf16.vlgmr.msra.gmra.mrb[8].mxu1 %vm316_vm2, %v3562_v39  ;;  %2953 = vmatprep.subr.msk.bf16.mxu1 %vm323_vm1, %v315_v61 }
  0xae   : > { %449 = vmatpush1.bf16.msra.mxu1 %v337_v57  ;;  %437 = vmatprep.mubr.bf16.mxu1 %v3357_v0 }
  0xaf   : > { %v3609_v1 = vpop.permute.xlu1 %1199  ;;  %v1198_v2 = vpop.permute.xlu0 %1197  ;;  %2958 = vmatprep.subr.msk.bf16.mxu1 %vm323_vm1, %v3431_v7 }
  0xb0   : > { %v1211_v3 = vsel %vm1209_vm5, %v1198_v2, %v3609_v1  ;;  %v1210_v16 = vsel %vm1209_vm5, %v1196_v58, %v1198_v2 }
  0xb1   : > { %2989 = vmatmul.mubr.msk.bf16.vlgmr.msra.gmra.mrb[0].mxu0 %vm316_vm2, %v3605_v62  ;;  %v1223_v20 = vsel %vm323_vm1, %v1210_v16, 0 }
  0xb2   : > { %1104 = vmatpush1.bf16.msra.mxu0 %v992_v63  ;;  %1039 = vmatprep.mubr.bf16.mxu0 %v3357_v0 }
  0xb3   : > { %v1206_v8 = vpop.permute.xlu1 %1205  ;;  %3003 = vmatprep.subr.msk.bf16.mxu0 %vm323_vm1, %v1211_v3  ;;  %v3626_v12 = vpop.permute.xlu0 %1203  ;;  %v3820_v3 = vld [vmem:[%s4046_s1 + $0x68] sm:$0xff]  }
  0xb4   : > { %v1214_v28 = vsel %vm1209_vm5, %v3626_v12, %v1206_v8 }
  0xb5   : > { %2952 = vmatmul.mubr.msk.bf16.gmra.mrb[12].mxu1 %vm316_vm2, %v3332_v50 }
  0xb6   : > { %480 = vmatprep.mubr.bf16.mxu1 %v3357_v0 }
  0xb7   : > { %v1439_v7 = vpop.permute.xlu1 %1438  ;;  %v1208_v17 = vpop.permute.xlu0 %1207 }
  0xb8   : > { %v1215_v21 = vsel %vm1209_vm5, %v1206_v8, %v1208_v17 }
  0xb9   : > { %2990 = vmatmul.mubr.msk.bf16.gmra.mrb[4].mxu0 %vm316_vm2, %v3623_v11 }
  0xba   : > { %1135 = vmatprep.mubr.bf16.mxu0 %v3357_v0 }
  0xbb   : > { %v1443_v13 = vpop.permute.xlu1 %1442  ;;  %v1441_v30 = vpop.permute.xlu0 %1440 }
  0xbc   : > { %v1454_v32 = vsel %vm1452_vm6, %v1441_v30, %v1443_v13 }
  0xbd   : > { %2954 = vmatmul.mubr.msk.bf16.vlgmr.msra.gmra.mrb[16].mxu1 %vm316_vm2, %v3562_v39 }
  0xbe   : > { %490 = vmatprep.mubr.bf16.mxu1 %v3357_v0  ;;  %536 = vmatpush1.bf16.msra.mxu1 %v518_v14 }
  0xbf   : > { %v3637_v18 = vpop.permute.xlu1 %1448  ;;  %2961 = vmatprep.subr.msk.bf16.mxu1 %vm323_vm1, %v3454_v10  ;;  %v3702_v37 = vpop.permute.xlu0 %1446 }
  0xc0   : > { %v1457_v45 = vsel %vm1452_vm6, %v3702_v37, %v3637_v18 }
  0xc1   : > { %2995 = vmatmul.mubr.msk.bf16.vlgmr.msra.gmra.mrb[8].mxu0 %vm316_vm2, %v3605_v62  ;;  %v1478_v49 = vsel %vm323_vm1, %v1457_v45, 0 }
  0xc2   : > { %1241 = vmatpush1.bf16.msra.mxu0 %v1223_v20  ;;  %1145 = vmatprep.mubr.bf16.mxu0 %v3357_v0 }
  0xc3   : > { %v716_v5 = vpop.permute.xlu1 %715  ;;  %3009 = vmatprep.subr.msk.bf16.mxu0 %vm323_vm1, %v1215_v21  ;;  %v1451_v42 = vpop.permute.xlu0 %1450 }
  0xc4   : > { %v726_v22 = vsel %vm723_vm0, %v3518_v15, %v716_v5  ;;  %v727_v23 = vsel %vm723_vm0, %v716_v5, %v3524_v19  ;;  %v524_v15 = vsel %vm323_vm1, %v3421_v4, 0  ;;  %v1235_v4 = vsel %vm323_vm1, %v1214_v28, 0 }
  0xc5   : > { %2955 = vmatmul.mubr.msk.bf16.gmra.mrb[20].mxu1 %vm316_vm2, %v3332_v50  ;;  %v1458_v6 = vsel %vm1452_vm6, %v3637_v18, %v1451_v42  ;;  %v743_v46 = vsel %vm323_vm1, %v726_v22, 0  ;;  %v2648_v42 = vld [vmem:[%s4048_s3 + $0x8] sm:$0xff] }
  0xc6   : > { %567 = vmatprep.mubr.bf16.mxu1 %v3357_v0  ;;  %2658 = vperm.xlu0 %3321, %v2648_v42  }
  0xc7   : > { %v3653_v10 = vpop.permute.xlu1 %1683  ;;  %v1682_v44 = vpop.permute.xlu0 %1681 }
  0xc8   : > { %v1696_v53 = vsel %vm1695_vm7, %v1682_v44, %v3653_v10 }
  0xc9   : > { %2996 = vmatmul.mubr.msk.bf16.gmra.mrb[12].mxu0 %vm316_vm2, %v3623_v11  ;;  %v1709_v57 = vsel %vm323_vm1, %v1696_v53, 0 }
  0xca   : > { %1272 = vmatprep.mubr.bf16.mxu0 %v3357_v0 }
  0xcb   : > { %v959_v26 = vpop.permute.xlu1 %958  ;;  %v3741_v48 = vpop.permute.xlu0 %1685 }
  0xcc   : > { %v3665_v19 = vsel %vm966_vm4, %v3565_v40, %v959_v26  ;;  %v970_v27 = vsel %vm966_vm4, %v959_v26, %v3584_v52  ;;  %v1453_v40 = vsel %vm1452_vm6, %v1439_v7, %v1441_v30  ;;  %v1697_v50 = vsel %vm1695_vm7, %v3653_v10, %v3741_v48  ;;  %v3344_v30 = vld [vmem:[%s4046_s1 + $0x78] sm:$0xff]  }
  0xcd   : > { %2959 = vmatmul.mubr.msk.bf16.vlgmr.msra.gmra.mrb[0].mxu1 %vm316_vm2, %v3335_v25  ;;  %v1466_v43 = vsel %vm323_vm1, %v1453_v40, 0  ;;  %v986_v54 = vsel %vm323_vm1, %v3665_v19, 0 }
  0xce   : > { %577 = vmatprep.mubr.bf16.mxu1 %v3357_v0  ;;  %589 = vmatpush1.bf16.msra.mxu1 %v524_v15  ;;  %v3857_v15 = vld [vmem:[%s4046_s1 + $0x70] sm:$0xff]  }
  0xcf   : > { %v3679_v31 = vpop.permute.xlu1 %1691  ;;  %2964 = vmatprep.subr.msk.bf16.mxu1 %vm323_vm1, %v3439_v9  ;;  %v3697_v9 = vld [vmem:[%s4046_s1 + $0x48] sm:$0xff]   ;;  %v1690_v52 = vpop.permute.xlu0 %1689 }
  0xd0   : > { %v1700_v60 = vsel %vm1695_vm7, %v1690_v52, %v3679_v31 }
  0xd1   : > { %3004 = vmatmul.mubr.msk.bf16.vlgmr.msra.gmra.mrb[0].mxu0 %vm316_vm2, %v3675_v29  ;;  %v1721_v2 = vsel %vm323_vm1, %v1700_v60, 0 }
  0xd2   : > { %1347 = vmatpush1.bf16.msra.mxu0 %v1235_v4  ;;  %1282 = vmatprep.mubr.bf16.mxu0 %v3357_v0 }
  0xd3   : > { %v3690_v35 = vpop.permute.xlu1 %1201  ;;  %3018 = vmatprep.subr.msk.bf16.mxu0 %vm323_vm1, %v1454_v32  ;;  %v1694_v55 = vpop.permute.xlu0 %1693 }
  0xd4   : > { %v1213_v56 = vsel %vm1209_vm5, %v3690_v35, %v3626_v12  ;;  %v1701_v58 = vsel %vm1695_vm7, %v3679_v31, %v1694_v55  ;;  %v1212_v59 = vsel %vm1209_vm5, %v3609_v1, %v3690_v35 }
  0xd5   : > { %2960 = vmatmul.mubr.msk.bf16.gmra.mrb[4].mxu1 %vm316_vm2, %v3337_v33  ;;  %v1229_v61 = vsel %vm323_vm1, %v1212_v59, 0 }
  0xd6   : > { %620 = vmatprep.mubr.bf16.mxu1 %v3357_v0 }
  0xd7   : > { %v3700_v36 = vpop.permute.xlu1 %1926 }
  0xd9   : > { %3005 = vmatmul.mubr.msk.bf16.gmra.mrb[4].mxu0 %vm316_vm2, %v3697_v9 }
  0xda   : > { %1378 = vmatprep.mubr.bf16.mxu0 %v3357_v0 }
  0xdb   : > { %v3709_v39 = vpop.permute.xlu1 %1444 }
  0xdc   : > { %v3714_v41 = vsel %vm1452_vm6, %v1443_v13, %v3709_v39  ;;  %v1456_v1 = vsel %vm1452_vm6, %v3709_v39, %v3702_v37 }
  0xdd   : > { %2962 = vmatmul.mubr.msk.bf16.vlgmr.msra.gmra.mrb[8].mxu1 %vm316_vm2, %v3335_v25 }
  0xde   : > { %642 = vmatpush1.bf16.msra.mxu1 %v530_v38  ;;  %630 = vmatprep.mubr.bf16.mxu1 %v3357_v0 }
  0xdf   : > { %2976 = vmatprep.subr.msk.bf16.mxu1 %vm323_vm1, %v727_v23  ;;  %v1935_v8 = vpop.permute.xlu1 %1934 }
  0xe1   : > { %3010 = vmatmul.mubr.msk.bf16.vlgmr.msra.gmra.mrb[8].mxu0 %vm316_vm2, %v3675_v29 }
  0xe2   : > { %1484 = vmatpush1.bf16.msra.mxu0 %v1466_v43  ;;  %1388 = vmatprep.mubr.bf16.mxu0 %v3357_v0  ;;  %v2649_v43 = vld [vmem:[%s4048_s3 + $0x10] sm:$0xff] }
  0xe3   : > { %3024 = vmatprep.subr.msk.bf16.mxu0 %vm323_vm1, %v1458_v6  ;;  %v1688_v13 = vpop.permute.xlu1 %1687  ;;  %v3366_v6 = vmov 65535  }
  0xe4   : > { %v1699_v16 = vsel %vm1695_vm7, %v1688_v13, %v1690_v52  ;;  %v1698_v5 = vsel %vm1695_vm7, %v3741_v48, %v1688_v13  ;;  %v2444_v44 = vsel %vm2443_vm10, 4294967295, %v3366_v6 }
  0xe5   : > { %2963 = vmatmul.mubr.msk.bf16.gmra.mrb[12].mxu1 %vm316_vm2, %v3337_v33  ;;  %v1715_v26 = vsel %vm323_vm1, %v1698_v5, 0  ;;  %v2445_v48 = vsel %vm323_vm1, %v2444_v44, 0 }
  0xe6   : > { %673 = vmatprep.mubr.bf16.mxu1 %v3357_v0 }
  0xe7   : > { %v2170_v20 = vpop.permute.xlu1 %2169 }
  0xe9   : > { %3011 = vmatmul.mubr.msk.bf16.gmra.mrb[12].mxu0 %vm316_vm2, %v3697_v9 }
  0xea   : > { %1515 = vmatprep.mubr.bf16.mxu0 %v3357_v0 }
  0xeb   : > { %v1931_v22 = vpop.permute.xlu1 %1930 }
  0xed   : > { %2965 = vmatmul.mubr.msk.bf16.vlgmr.msra.gmra.mrb[16].mxu1 %vm316_vm2, %v3335_v25 }
  0xee   : > { %808 = vmatpush1.bf16.msra.mxu1 %v743_v46  ;;  %683 = vmatprep.mubr.bf16.mxu1 %v3357_v0 }
  0xef   : > { %2991 = vmatprep.subr.msk.bf16.mxu1 %vm323_vm1, %v970_v27 }
  0xf1   : > { %3019 = vmatmul.mubr.msk.bf16.vlgmr.msra.gmra.mrb[0].mxu0 %vm316_vm2, %v3739_v47 }
  0xf2   : > { %1590 = vmatpush1.bf16.msra.mxu0 %v1478_v49  ;;  %1525 = vmatprep.mubr.bf16.mxu0 %v3357_v0 }
  0xf3   : > { %3033 = vmatprep.subr.msk.bf16.mxu0 %vm323_vm1, %v1697_v50  ;;  %v2650_v50 = vld [vmem:[%s4048_s3 + $0x18] sm:$0xff] }
  0xf5   : > { %2966 = vmatmul.mubr.msk.bf16.gmra.mrb[20].mxu1 %vm316_vm2, %v3337_v33 }
  0xf6   : > { %839 = vmatprep.mubr.bf16.mxu1 %v3357_v0 }
  0xf9   : > { %3020 = vmatmul.mubr.msk.bf16.gmra.mrb[4].mxu0 %vm316_vm2, %v3757_v51 }
  0xfa   : > { %1621 = vmatprep.mubr.bf16.mxu0 %v3357_v0 }
  0xfd   : > { %2977 = vmatmul.mubr.msk.bf16.vlgmr.msra.gmra.mrb[8].mxu1 %vm316_vm2, %v3534_v24  ;;  %v1925_v24 = vpop.permute.xlu0 %1924 }
  0xfe   : > { %1051 = vmatpush1.bf16.msra.mxu1 %v986_v54  ;;  %849 = vmatprep.mubr.bf16.mxu1 %v3357_v0  ;;  %v1939_v12 = vsel %vm1938_vm8, %v1925_v24, %v3700_v36  ;;  %v3346_v24 = vld [vmem:[%s4046_s1 + $0x88] sm:$0xff]  }
  0xff   : > { %3006 = vmatprep.subr.msk.bf16.mxu1 %vm323_vm1, %v1213_v56  ;;  %v1952_v17 = vsel %vm323_vm1, %v1939_v12, 0  ;;  %v3345_v56 = vld [vmem:[%s4046_s1 + $0x80] sm:$0xff]   ;;  %v3348_v12 = vld [vmem:[%s4047_s2 + $0x8] sm:$0xff]  }
 0x101   : > { %3025 = vmatmul.mubr.msk.bf16.vlgmr.msra.gmra.mrb[8].mxu0 %vm316_vm2, %v3739_v47  ;;  %v3800_v63 = vpop.permute.xlu0 %1928 }
 0x102   : > { %1727 = vmatpush1.bf16.msra.mxu0 %v1709_v57  ;;  %1631 = vmatprep.mubr.bf16.mxu0 %v3357_v0  ;;  %v1941_v33 = vsel %vm1938_vm8, %v3800_v63, %v1931_v22 }
 0x103   : > { %3039 = vmatprep.subr.msk.bf16.mxu0 %vm323_vm1, %v1701_v58 }
 0x105   : > { %2978 = vmatmul.mubr.msk.bf16.gmra.mrb[12].mxu1 %vm316_vm2, %v3552_v34  ;;  %v3798_v34 = vld [vmem:[%s4046_s1 + $0x60] sm:$0xff]   ;;  %v1933_v7 = vpop.permute.xlu0 %1932 }
 0x106   : > { %1082 = vmatprep.mubr.bf16.mxu1 %v3357_v0  ;;  %v1942_v10 = vsel %vm1938_vm8, %v1931_v22, %v1933_v7  ;;  %v1943_v25 = vsel %vm1938_vm8, %v1933_v7, %v1935_v8 }
 0x107   : > { %v1964_v19 = vsel %vm323_vm1, %v1943_v25, 0 }
 0x109   : > { %3026 = vmatmul.mubr.msk.bf16.gmra.mrb[12].mxu0 %vm316_vm2, %v3757_v51  ;;  %v1937_v14 = vpop.permute.xlu0 %1936 }
 0x10a   : > { %1758 = vmatprep.mubr.bf16.mxu0 %v3357_v0  ;;  %v1944_v18 = vsel %vm1938_vm8, %v1935_v8, %v1937_v14 }
 0x10d   : > { %2992 = vmatmul.mubr.msk.bf16.vlgmr.msra.gmra.mrb[8].mxu1 %vm316_vm2, %v3605_v62  ;;  %v1940_v62 = vsel %vm1938_vm8, %v3700_v36, %v3800_v63  ;;  %v2168_v21 = vpop.permute.xlu0 %2167  ;;  %v1958_v36 = vsel %vm323_vm1, %v1941_v33, 0 }
 0x10e   : > { %1294 = vmatpush1.bf16.msra.mxu1 %v1229_v61  ;;  %1092 = vmatprep.mubr.bf16.mxu1 %v3357_v0  ;;  %v2182_v35 = vsel %vm2181_vm9, %v2168_v21, %v2170_v20 }
 0x10f   : > { %3021 = vmatprep.subr.msk.bf16.mxu1 %vm323_vm1, %v1456_v1  ;;  %v2195_v37 = vsel %vm323_vm1, %v2182_v35, 0 }
 0x111   : > { %3034 = vmatmul.mubr.msk.bf16.vlgmr.msra.gmra.mrb[0].mxu0 %vm316_vm2, %v3798_v34  ;;  %v2172_v23 = vpop.permute.xlu0 %2171 }
 0x112   : > { %1833 = vmatpush1.bf16.msra.mxu0 %v1721_v2  ;;  %1768 = vmatprep.mubr.bf16.mxu0 %v3357_v0  ;;  %v2183_v27 = vsel %vm2181_vm9, %v2170_v20, %v2172_v23 }
 0x113   : > { %3048 = vmatprep.subr.msk.bf16.mxu0 %vm323_vm1, %v1940_v62 }
 0x115   : > { %2993 = vmatmul.mubr.msk.bf16.gmra.mrb[12].mxu1 %vm316_vm2, %v3623_v11  ;;  %v1472_v11 = vsel %vm323_vm1, %v3714_v41, 0  ;;  %v2176_v28 = vpop.permute.xlu0 %2175  ;;  %v2647_v41 = vld [vmem:[%s4048_s3] sm:$0xff] }
 0x116   : > { %1325 = vmatprep.mubr.bf16.mxu1 %v3357_v0  ;;  %2653 = vperm.xlu1 %3320, %v2647_v41  }
 0x119   : > { %3035 = vmatmul.mubr.msk.bf16.gmra.mrb[4].mxu0 %vm316_vm2, %v3820_v3  ;;  %v2180_v4 = vpop.permute.xlu0 %2179 }
 0x11a   : > { %1864 = vmatprep.mubr.bf16.mxu0 %v3357_v0  ;;  %2663 = vperm.xlu1 %3320, %v2649_v43  }
 0x11d   : > { %3007 = vmatmul.mubr.msk.bf16.vlgmr.msra.gmra.mrb[8].mxu1 %vm316_vm2, %v3675_v29  ;;  %v2178_v29 = vpop.permute.xlu1 %2177  ;;  %v3874_v32 = vpop.permute.xlu0 %2418 }
 0x11e   : > { %1537 = vmatpush1.bf16.msra.mxu1 %v1472_v11  ;;  %1335 = vmatprep.mubr.bf16.mxu1 %v3357_v0  ;;  %v2187_v40 = vsel %vm2181_vm9, %v2178_v29, %v2180_v4  ;;  %v2186_v54 = vsel %vm2181_vm9, %v2176_v28, %v2178_v29 }
 0x11f   : > { %3036 = vmatprep.subr.msk.bf16.mxu1 %vm323_vm1, %v1699_v16  ;;  %2668 = vperm.xlu1 %3320, %v2650_v50   ;;  %v2207_v57 = vsel %vm323_vm1, %v2186_v54, 0 }
 0x121   : > { %3040 = vmatmul.mubr.msk.bf16.vlgmr.msra.gmra.mrb[8].mxu0 %vm316_vm2, %v3798_v34  ;;  %v2174_v31 = vpop.permute.xlu1 %2173  ;;  %v2417_v39 = vpop.permute.xlu0 %2416 }
 0x122   : > { %1970 = vmatpush1.bf16.msra.mxu0 %v1952_v17  ;;  %1874 = vmatprep.mubr.bf16.mxu0 %v3357_v0  ;;  %v2430_v63 = vsel %vm1209_vm5, %v2417_v39, %v3874_v32 }
 0x123   : > { %3054 = vmatprep.subr.msk.bf16.mxu0 %vm323_vm1, %v1944_v18  ;;  %v2447_v2 = vand.u32 %v2445_v48, %v2430_v63 }
 0x125   : > { %3008 = vmatmul.mubr.msk.bf16.gmra.mrb[12].mxu1 %vm316_vm2, %v3697_v9  ;;  %v2185_v9 = vsel %vm2181_vm9, %v2174_v31, %v2176_v28  ;;  %v2421_v38 = vpop.permute.xlu1 %2420  ;;  %v2425_v46 = vpop.permute.xlu0 %2424 }
 0x126   : > { %1568 = vmatprep.mubr.bf16.mxu1 %v3357_v0  ;;  %v2431_v55 = vsel %vm1209_vm5, %v3874_v32, %v2421_v38 }
 0x127   : > { %v2450_v58 = vand.u32 %v2445_v48, %v2431_v55 }
 0x129   : > { %3041 = vmatmul.mubr.msk.bf16.gmra.mrb[12].mxu0 %vm316_vm2, %v3820_v3  ;;  %v2423_v45 = vpop.permute.xlu1 %2422  ;;  %v2429_v61 = vpop.permute.xlu0 %2428 }
 0x12a   : > { %2001 = vmatprep.mubr.bf16.mxu0 %v3357_v0  ;;  %v2433_v49 = vsel %vm1209_vm5, %v2423_v45, %v2425_v46  ;;  %v2432_v59 = vsel %vm1209_vm5, %v2421_v38, %v2423_v45 }
 0x12b   : > { %v2456_v53 = vand.u32 %v2445_v48, %v2433_v49 }
 0x12d   : > { %3022 = vmatmul.mubr.msk.bf16.vlgmr.msra.gmra.mrb[8].mxu1 %vm316_vm2, %v3739_v47  ;;  %v2184_v47 = vsel %vm2181_vm9, %v2172_v23, %v2174_v31  ;;  %v2427_v60 = vpop.permute.xlu1 %2426 }
 0x12e   : > { %1780 = vmatpush1.bf16.msra.mxu1 %v1715_v26  ;;  %1578 = vmatprep.mubr.bf16.mxu1 %v3357_v0  ;;  %v2201_v52 = vsel %vm323_vm1, %v2184_v47, 0  ;;  %v2435_v1 = vsel %vm1209_vm5, %v2427_v60, %v2429_v61  ;;  %v2434_v8 = vsel %vm1209_vm5, %v2425_v46, %v2427_v60 }
 0x12f   : > { %3051 = vmatprep.subr.msk.bf16.mxu1 %vm323_vm1, %v1942_v10  ;;  %v2462_v62 = vand.u32 %v2445_v48, %v2435_v1  ;;  %v2459_v7 = vand.u32 %v2445_v48, %v2434_v8 }
 0x131   : > { %3049 = vmatmul.mubr.msk.bf16.vlgmr.msra.gmra.mrb[0].mxu0 %vm316_vm2, %v3857_v15 }
 0x132   : > { %2076 = vmatpush1.bf16.msra.mxu0 %v1964_v19  ;;  %2011 = vmatprep.mubr.bf16.mxu0 %v3357_v0 }
 0x133   : > { %3063 = vmatprep.subr.msk.bf16.mxu0 %vm323_vm1, %v2183_v27 }
 0x135   : > { %3023 = vmatmul.mubr.msk.bf16.gmra.mrb[12].mxu1 %vm316_vm2, %v3757_v51  ;;  %v2732_v51 = vld [vmem:[%s4050_s5] sm:$0xff] }
 0x136   : > { %1811 = vmatprep.mubr.bf16.mxu1 %v3357_v0  ;;  %2735 = vperm.xlu0 %3321, %v2732_v51  }
 0x139   : > { %3050 = vmatmul.mubr.msk.bf16.gmra.mrb[4].mxu0 %vm316_vm2, %v3344_v30 }
 0x13a   : > { %2107 = vmatprep.mubr.bf16.mxu0 %v3357_v0 }
 0x13d   : > { %3037 = vmatmul.mubr.msk.bf16.vlgmr.msra.gmra.mrb[8].mxu1 %vm316_vm2, %v3798_v34  ;;  %v2453_v34 = vand.u32 %v2445_v48, %v2432_v59 }
 0x13e   : > { %2023 = vmatpush1.bf16.msra.mxu1 %v1958_v36  ;;  %1821 = vmatprep.mubr.bf16.mxu1 %v3357_v0 }
 0x13f   : > { %3066 = vmatprep.subr.msk.bf16.mxu1 %vm323_vm1, %v2185_v9 }
 0x141   : > { %3055 = vmatmul.mubr.msk.bf16.vlgmr.msra.gmra.mrb[8].mxu0 %vm316_vm2, %v3857_v15 }
 0x142   : > { %2213 = vmatpush1.bf16.msra.mxu0 %v2195_v37  ;;  %2117 = vmatprep.mubr.bf16.mxu0 %v3357_v0 }
 0x143   : > { %3069 = vmatprep.subr.msk.bf16.mxu0 %vm323_vm1, %v2187_v40 }
 0x145   : > { %3038 = vmatmul.mubr.msk.bf16.gmra.mrb[12].mxu1 %vm316_vm2, %v3820_v3  ;;  %v3347_v3 = vld [vmem:[%s4047_s2] sm:$0xff]   ;;  %v3987_v29 = vpop.permute.xlu0 %2658 }
 0x146   : > { %2054 = vmatprep.mubr.bf16.mxu1 %v3357_v0 }
 0x149   : > { %3056 = vmatmul.mubr.msk.bf16.gmra.mrb[12].mxu0 %vm316_vm2, %v3344_v30 }
 0x14a   : > { %2244 = vmatprep.mubr.bf16.mxu0 %v3357_v0 }
 0x14d   : > { %3052 = vmatmul.mubr.msk.bf16.vlgmr.msra.gmra.mrb[8].mxu1 %vm316_vm2, %v3857_v15 }
 0x14e   : > { %2266 = vmatpush1.bf16.msra.mxu1 %v2201_v52  ;;  %2064 = vmatprep.mubr.bf16.mxu1 %v3357_v0 }
 0x14f   : > { %2517 = vmatprep.subr.bf16.mxu1 %v2456_v53 }
 0x151   : > { %3064 = vmatmul.mubr.msk.bf16.vlgmr.msra.gmra.mrb[0].mxu0 %vm316_vm2, %v3345_v56 }
 0x152   : > { %2319 = vmatpush1.bf16.msra.mxu0 %v2207_v57  ;;  %2254 = vmatprep.mubr.bf16.mxu0 %v3357_v0 }
 0x153   : > { %2464 = vmatprep.subr.bf16.mxu0 %v2450_v58 }
 0x155   : > { %3053 = vmatmul.mubr.msk.bf16.gmra.mrb[12].mxu1 %vm316_vm2, %v3344_v30 }
 0x156   : > { %2297 = vmatprep.mubr.bf16.mxu1 %v3357_v0 }
 0x159   : > { %3065 = vmatmul.mubr.msk.bf16.gmra.mrb[4].mxu0 %vm316_vm2, %v3346_v24 }
 0x15a   : > { %2350 = vmatprep.mubr.bf16.mxu0 %v3357_v0 }
 0x15d   : > { %3067 = vmatmul.mubr.msk.bf16.vlgmr.msra.gmra.mrb[8].mxu1 %vm316_vm2, %v3345_v56 }
 0x15e   : > { %2307 = vmatprep.mubr.bf16.mxu1 %v3357_v0  ;;  %2518 = vmatpush1.bf16.msra.mxu1 %v2453_v34 }
 0x161   : > { %3070 = vmatmul.mubr.msk.bf16.vlgmr.msra.gmra.mrb[8].mxu0 %vm316_vm2, %v3345_v56 }
 0x162   : > { %2465 = vmatpush1.bf16.msra.mxu0 %v2447_v2  ;;  %2360 = vmatprep.mubr.bf16.mxu0 %v3357_v0 }
 0x163   : > { %2570 = vmatprep.subr.bf16.mxu0 %v2462_v62 }
 0x165   : > { %3068 = vmatmul.mubr.msk.bf16.gmra.mrb[12].mxu1 %vm316_vm2, %v3346_v24 }
 0x166   : > { %2549 = vmatprep.mubr.bf16.mxu1 %v3357_v0 }
 0x169   : > { %3071 = vmatmul.mubr.msk.bf16.gmra.mrb[12].mxu0 %vm316_vm2, %v3346_v24 }
 0x16a   : > { %2496 = vmatprep.mubr.bf16.mxu0 %v3357_v0 }
 0x16d   : > { %3076 = vmatmul.mubr.msk.bf16.vlgmr.msra.gmra.mrb[8].mxu1 %vm2436_vm11, %v3347_v3 }
 0x16e   : > { %2559 = vmatprep.mubr.bf16.mxu1 %v3357_v0 }
 0x171   : > { %3074 = vmatmul.mubr.msk.bf16.vlgmr.msra.gmra.mrb[0].mxu0 %vm2436_vm11, %v3347_v3 }
 0x172   : > { %2571 = vmatpush1.bf16.msra.mxu0 %v2459_v7  ;;  %2506 = vmatprep.mubr.bf16.mxu0 %v3357_v0 }
 0x175   : > { %3077 = vmatmul.mubr.msk.bf16.gmra.mrb[12].mxu1 %vm2436_vm11, %v3348_v12 }
 0x176   : > { %2774 = vmatprep.mubr.bf16.mxu1 %v3357_v0 }
 0x179   : > { %3075 = vmatmul.mubr.msk.bf16.gmra.mrb[4].mxu0 %vm2436_vm11, %v3348_v12 }
 0x17a   : > { %2602 = vmatprep.mubr.bf16.mxu0 %v3357_v0 }
 0x181   : > { %3078 = vmatmul.mubr.msk.bf16.vlgmr.msra.gmra.mrb[8].mxu0 %vm2436_vm11, %v3347_v3 }
 0x182   : > { %2612 = vmatprep.mubr.bf16.mxu0 %v3357_v0 }
 0x189   : > { %3079 = vmatmul.mubr.msk.bf16.gmra.mrb[12].mxu0 %vm2436_vm11, %v3348_v12 }
 0x195   : > { %v3985_v27 = vpop.permute.xlu1 %2653 }
 0x199   : > { %v3991_v33 = vpop.permute.xlu1 %2663 }
 0x19e   : > { %v3999_v53 = vpop.permute.xlu1 %2668 }
 0x1a0   : > { %v569_v11 = vpop.f32.mrb[0].mxu1 }
 0x1a1   : > { %v571_v13 = vpop.f32.mrb[1].mxu1 }
 0x1a2   : > { %v573_v14 = vpop.f32.mrb[2].mxu1 }
 0x1a3   : > { %v575_v16 = vpop.f32.mrb[3].mxu1 }
 0x1a8   : > { %v579_v17 = vpop.f32.mrb[4].mxu1 }
 0x1a9   : > { %v581_v18 = vpop.f32.mrb[5].mxu1 }
 0x1aa   : > { %v3965_v20 = vpop.f32.mrb[6].mxu1 }
 0x1ab   : > { %v3967_v21 = vpop.f32.mrb[7].mxu1 }
 0x1c0   : > { %v3969_v5 = vpop.f32.mrb[16].mxu1 }
 0x1c1   : > { %v3971_v22 = vpop.f32.mrb[17].mxu1 }
 0x1c2   : > { %v3973_v23 = vpop.f32.mrb[18].mxu1 }
 0x1c3   : > { %v3975_v10 = vpop.f32.mrb[19].mxu1 }
 0x1c8   : > { %v3977_v25 = vpop.f32.mrb[20].mxu1 }
 0x1c9   : > { %v3979_v26 = vpop.f32.mrb[21].mxu1 }
 0x1ca   : > { %v3981_v15 = vpop.f32.mrb[22].mxu1 }
 0x1cb   : > { %v3983_v19 = vpop.f32.mrb[23].mxu1 }
 0x240   : > { %v2551_v28 = vpop.f32.mrb[8].mxu1 }
 0x241   : > { %v2673_v30 = vadd.f32 %v3985_v27, %v2551_v28  ;;  %v2553_v4 = vpop.f32.mrb[9].mxu1 }
 0x242   : > { %v2674_v31 = vadd.f32 %v3985_v27, %v2553_v4  ;;  %v2555_v32 = vpop.f32.mrb[10].mxu1 }
 0x243   : > { %v2679_v35 = vadd.f32 %v3987_v29, %v2555_v32  ;;  %v2557_v9 = vpop.f32.mrb[11].mxu1  ;;  %v2697_v38 = vmax.f32 %v2673_v30, 0.0 }
 0x244   : > { %v2680_v36 = vadd.f32 %v3987_v29, %v2557_v9  ;;  %v2498_v37 = vpop.f32.mrb[0].mxu0  ;;  %v2698_v42 = vmax.f32 %v2674_v31, 0.0 }
 0x245   : > { %v2703_v39 = vmax.f32 %v2679_v35, 0.0  ;;  %v3085_v40 = vadd.f32 %v2498_v37, %v569_v11  ;;  %v2500_v41 = vpop.f32.mrb[1].mxu0 }
 0x246   : > { %v2704_v43 = vmax.f32 %v2680_v36, 0.0  ;;  %v3086_v6 = vadd.f32 %v2500_v41, %v571_v13  ;;  %v2502_v44 = vpop.f32.mrb[2].mxu0 }
 0x247   : > { %v3995_v45 = vpack.c.bf16 %v2703_v39, %v2697_v38  ;;  %v2671_v46 = vadd.f32 %v3085_v40, %v3985_v27  ;;  %v3087_v47 = vadd.f32 %v2502_v44, %v573_v14  ;;  %v2504_v48 = vpop.f32.mrb[3].mxu0 }
 0x248   : > { %v2722_v49 = vpack.c.bf16 %v2704_v43, %v2698_v42  ;;  %v2672_v50 = vadd.f32 %v3086_v6, %v3985_v27  ;;  %v3088_v51 = vadd.f32 %v2504_v48, %v575_v16  ;;  %v2561_v52 = vpop.f32.mrb[12].mxu1 }
 0x249   : > { %v2677_v54 = vadd.f32 %v3087_v47, %v3987_v29  ;;  %v2685_v55 = vadd.f32 %v3991_v33, %v2561_v52  ;;  %v2563_v56 = vpop.f32.mrb[13].mxu1  ;;  %v2695_v59 = vmax.f32 %v2671_v46, 0.0 }
 0x24a   : > { %v2678_v57 = vadd.f32 %v3088_v51, %v3987_v29  ;;  %v2686_v58 = vadd.f32 %v3991_v33, %v2563_v56  ;;  %v2565_v24 = vpop.f32.mrb[14].mxu1  ;;  %v2696_v63 = vmax.f32 %v2672_v50, 0.0 }
 0x24b   : > { %v2701_v60 = vmax.f32 %v2677_v54, 0.0  ;;  %v2691_v61 = vadd.f32 %v3999_v53, %v2565_v24  ;;  %v2567_v34 = vpop.f32.mrb[15].mxu1  ;;  %v2709_v8 = vmax.f32 %v2685_v55, 0.0 }
 0x24c   : > { %v2702_v1 = vmax.f32 %v2678_v57, 0.0  ;;  %v2692_v2 = vadd.f32 %v3999_v53, %v2567_v34  ;;  %v2508_v62 = vpop.f32.mrb[4].mxu0  ;;  %v2710_v13 = vmax.f32 %v2686_v58, 0.0 }
 0x24d   : > { %v2719_v3 = vpack.c.bf16 %v2701_v60, %v2695_v59  ;;  %v2715_v7 = vmax.f32 %v2691_v61, 0.0  ;;  %v3089_v12 = vadd.f32 %v2508_v62, %v579_v17  ;;  %v2510_v11 = vpop.f32.mrb[5].mxu0 }
 0x24e   : > { %v2716_v14 = vmax.f32 %v2692_v2, 0.0  ;;  %v3090_v16 = vadd.f32 %v2510_v11, %v581_v18  ;;  %v2512_v28 = vpop.f32.mrb[6].mxu0  ;;  %v2720_v30 = vpack.c.bf16 %v2702_v1, %v2696_v63 }
 0x24f   : > { %v2727_v4 = vpack.c.bf16 %v2715_v7, %v2709_v8  ;;  %v2683_v31 = vadd.f32 %v3089_v12, %v3991_v33  ;;  %v3091_v32 = vadd.f32 %v2512_v28, %v3965_v20  ;;  %v2514_v35 = vpop.f32.mrb[7].mxu0 }
 0x250   : > { %v2728_v9 = vpack.c.bf16 %v2716_v14, %v2710_v13  ;;  %v2684_v36 = vadd.f32 %v3090_v16, %v3991_v33  ;;  %v3092_v37 = vadd.f32 %v2514_v35, %v3967_v21  ;;  %2742 = vmatprep.subr.bf16.mxu1 %v2720_v30 }
 0x251   : > { %v2689_v17 = vadd.f32 %v3091_v32, %v3999_v53  ;;  %2743 = vmatpush1.bf16.msra.mxu1 %v2719_v3  ;;  %v2707_v18 = vmax.f32 %v2683_v31, 0.0 }
 0x252   : > { %v2690_v38 = vadd.f32 %v3092_v37, %v3999_v53  ;;  %v2708_v40 = vmax.f32 %v2684_v36, 0.0 }
 0x253   : > { %v2713_v39 = vmax.f32 %v2689_v17, 0.0 }
 0x254   : > { %v2714_v41 = vmax.f32 %v2690_v38, 0.0  ;;  %v2604_v42 = vpop.f32.mrb[8].mxu0 }
 0x255   : > { %v2725_v43 = vpack.c.bf16 %v2713_v39, %v2707_v18  ;;  %v3093_v20 = vadd.f32 %v2604_v42, %v3969_v5  ;;  %v2606_v6 = vpop.f32.mrb[9].mxu0  ;;  %v2731_v5 = vld [vmem:[%s4049_s4] sm:$0xf] }
 0x256   : > { %v3094_v44 = vadd.f32 %v2606_v6, %v3971_v22  ;;  %v2608_v46 = vpop.f32.mrb[10].mxu0  ;;  %v2726_v47 = vpack.c.bf16 %v2714_v41, %v2708_v40 }
 0x257   : > { %v2675_v21 = vadd.f32 %v3093_v20, %v3985_v27  ;;  %v3095_v48 = vadd.f32 %v2608_v46, %v3973_v23  ;;  %v2610_v50 = vpop.f32.mrb[11].mxu0 }
 0x258   : > { %v2676_v51 = vadd.f32 %v3094_v44, %v3985_v27  ;;  %v3096_v52 = vadd.f32 %v2610_v50, %v3975_v10  ;;  %2744 = vmatprep.subr.bf16.mxu1 %v2726_v47 }
 0x259   : > { %v2681_v54 = vadd.f32 %v3095_v48, %v3987_v29  ;;  %2745 = vmatpush1.bf16.msra.mxu1 %v2725_v43  ;;  %v2699_v55 = vmax.f32 %v2675_v21, 0.0 }
 0x25a   : > { %v2682_v22 = vadd.f32 %v3096_v52, %v3987_v29  ;;  %2783 = vmatprep.subr.bf16.mxu1 %v2722_v49  ;;  %v2700_v23 = vmax.f32 %v2676_v51, 0.0 }
 0x25b   : > { %v2705_v56 = vmax.f32 %v2681_v54, 0.0 }
 0x25c   : > { %v2706_v57 = vmax.f32 %v2682_v22, 0.0  ;;  %v2614_v58 = vpop.f32.mrb[12].mxu0  ;;  %3080 = vmatmul.mubr.msk.bf16.vlgmr.msra.gmra.mrb[24].mxu1 %vm2738_vm12, %v2731_v5 }
 0x25d   : > { %v2723_v10 = vpack.c.bf16 %v2705_v56, %v2699_v55  ;;  %v3097_v27 = vadd.f32 %v2614_v58, %v3977_v25  ;;  %v2616_v24 = vpop.f32.mrb[13].mxu0  ;;  %2784 = vmatpush1.bf16.msra.mxu1 %v3995_v45  ;;  %2815 = vmatprep.mubr.bf16.mxu1 %v3357_v0 }
 0x25e   : > { %v3098_v59 = vadd.f32 %v2616_v24, %v3979_v26  ;;  %v2618_v60 = vpop.f32.mrb[14].mxu0  ;;  %2785 = vmatprep.subr.bf16.mxu1 %v2728_v9  ;;  %v2724_v29 = vpack.c.bf16 %v2706_v57, %v2700_v23 }
 0x25f   : > { %v2687_v49 = vadd.f32 %v3097_v27, %v3991_v33  ;;  %v3099_v61 = vadd.f32 %v2618_v60, %v3981_v15  ;;  %v2620_v34 = vpop.f32.mrb[15].mxu0 }
 0x260   : > { %v2688_v63 = vadd.f32 %v3098_v59, %v3991_v33  ;;  %v3100_v1 = vadd.f32 %v2620_v34, %v3983_v19  ;;  %v2736_v19 = vpop.permute.xlu0 %2735 }
 0x261   : > { %v2693_v25 = vadd.f32 %v3099_v61, %v3999_v53  ;;  %2786 = vmatpush1.bf16.msra.mxu1 %v2727_v4  ;;  %v2711_v26 = vmax.f32 %v2687_v49, 0.0 }
 0x262   : > { %v2694_v45 = vadd.f32 %v3100_v1, %v3999_v53  ;;  %2824 = vmatprep.subr.bf16.mxu1 %v2724_v29  ;;  %v2712_v62 = vmax.f32 %v2688_v63, 0.0 }
 0x263   : > { %v2717_v2 = vmax.f32 %v2693_v25, 0.0 }
 0x264   : > { %v2718_v3 = vmax.f32 %v2694_v45, 0.0  ;;  %3081 = vmatmul.mubr.msk.bf16.vlgmr.msra.gmra.mrb[28].mxu1 %vm2738_vm12, %v2731_v5 }
 0x265   : > { %v2729_v8 = vpack.c.bf16 %v2717_v2, %v2711_v26  ;;  %2825 = vmatpush1.bf16.msra.mxu1 %v2723_v10  ;;  %2856 = vmatprep.mubr.bf16.mxu1 %v3357_v0 }
 0x266   : > { %v2730_v15 = vpack.c.bf16 %v2718_v3, %v2712_v62 }
 0x268   : > { %2826 = vmatprep.subr.bf16.mxu1 %v2730_v15 }
 0x269   : > { %2827 = vmatpush1.bf16.msra.mxu1 %v2729_v8 }
 0x26c   : > { %3082 = vmatmul.mubr.msk.bf16.vlgmr.msra.gmra.mrb[32].mxu1 %vm2738_vm12, %v2731_v5 }
 0x32f   : > { %v2776_v33 = vpop.f32.mrb[24].mxu1 }
 0x330   : > { %v2777_v53 = vadd.f32 %v2776_v33, %v2736_v19  ;;  %v2778_v7 = vpop.f32.mrb[25].mxu1 }
 0x331   : > { %v2779_v12 = vadd.f32 %v2778_v7, %v2736_v19  ;;  %v2780_v11 = vpop.f32.mrb[26].mxu1 }
 0x332   : > { %2865 = vst [vmem:[%s251_s26] sm:$0xff] %v2777_v53  ;;  %v2781_v0 = vpop.f32.mrb[27].mxu1 }
 0x333   : > { %2866 = vst [vmem:[%s251_s26 + $0x8] sm:$0xff] %v2779_v12 }
 0x337   : > { %v2817_v13 = vpop.f32.mrb[28].mxu1 }
 0x338   : > { %v2818_v14 = vadd.f32 %v2817_v13, %v2736_v19  ;;  %v2819_v16 = vpop.f32.mrb[29].mxu1 }
 0x339   : > { %v2820_v28 = vadd.f32 %v2819_v16, %v2736_v19  ;;  %v2821_v30 = vpop.f32.mrb[30].mxu1 }
 0x33a   : > { %2867 = vst [vmem:[%s251_s26 + $0x10] sm:$0xff] %v2818_v14  ;;  %v2822_v4 = vpop.f32.mrb[31].mxu1 }
 0x33b   : > { %2868 = vst [vmem:[%s251_s26 + $0x18] sm:$0xff] %v2820_v28 }
 0x33f   : > { %v2858_v31 = vpop.f32.mrb[32].mxu1 }
 0x340   : > { %v2859_v32 = vadd.f32 %v2858_v31, %v2736_v19  ;;  %v2860_v35 = vpop.f32.mrb[33].mxu1 }
 0x341   : > { %v2861_v9 = vadd.f32 %v2860_v35, %v2736_v19  ;;  %v2862_v36 = vpop.f32.mrb[34].mxu1 }
 0x342   : > { %2869 = vst [vmem:[%s251_s26 + $0x20] sm:$0xff] %v2859_v32  ;;  %v2863_v37 = vpop.f32.mrb[35].mxu1 }
 0x343   : > { %2870 = vst [vmem:[%s251_s26 + $0x28] sm:$0xff] %v2861_v9 }
 0x344 PF: > { %s16_s21 = sadd.s32 1, %s3355_s21  }
 0x345   : > { %p13_p5 = scmp.ge.s32.totalorder %s16_s21, 4  }
 0x347   :  { %15 = sbr.rel (!%p13_p5) target bundleno = 1 (0x1), region = 82 }

</bundles_post_ra>
